<compile_context>
chip_gen: v7x
topology: tpu7x:2x2x1
jax: 0.10.0
libtpu: 0.0.40
codegen_flags: <defaults>
</compile_context>

<pallas_src>
import math
from functools import partial

import jax
import jax.numpy as jnp
from jax.experimental import pallas as pl
from jax.experimental.pallas import tpu as pltpu

LN_EPS = 1e-12  # BERT layernorm eps
ACT_DTYPE = jnp.bfloat16


# ---------------- small helpers ----------------

def _layernorm(x, gamma, beta):
    mu = jnp.mean(x, axis=-1, keepdims=True)
    var = jnp.mean(jnp.square(x - mu), axis=-1, keepdims=True)
    return (x - mu) * jax.lax.rsqrt(var + LN_EPS) * gamma + beta


def _gelu(x):
    # Exact erf-based GELU (matches HF BertModel); erf lowers to the EUP.
    return 0.5 * x * (1.0 + jax.lax.erf(x * (1.0 / math.sqrt(2.0))))


def _row_tile(s, cap=512):
    # Largest tile first: amortizes ~0.35us/grid-step and keeps MXU matmuls tall.
    for t in (512, 384, 256, 128):
        if t <= cap and s % t == 0:
            return t
    return s


def _cparams(dims):
    # 48 MiB scoped VMEM: above the 32 MiB default, with headroom under v7x's
    # 64 MiB physical per-TC VMEM (trivially fine on 128 MiB v5e/v6e).
    return pltpu.CompilerParams(
        dimension_semantics=dims,
        vmem_limit_bytes=48 * 1024 * 1024)


def _probe_buffered_one():
    """Return True iff this Pallas build supports single-buffered inputs."""
    try:
        def _k(x_ref, w_ref, o_ref):
            o_ref[...] = x_ref[...] + w_ref[...]
        f = pl.pallas_call(
            _k,
            grid=(2, 2),
            in_specs=[pl.BlockSpec((1, 8, 128), lambda i, j: (i, j, 0)),
                      pl.BlockSpec((8, 128), lambda i, j: (0, 0),
                                   pipeline_mode=pl.Buffered(1))],
            out_specs=pl.BlockSpec((1, 8, 128), lambda i, j: (i, j, 0)),
            out_shape=jax.ShapeDtypeStruct((2, 16, 128), jnp.float32),
        )
        x = jnp.zeros((2, 16, 128), jnp.float32)
        w = jnp.ones((8, 128), jnp.bfloat16)
        jax.jit(f).lower(x, w).compile()
        return True
    except Exception:
        return False


_BUFFERED_ONE_OK = _probe_buffered_one()


def _const_spec(shape):
    """BlockSpec for a grid-invariant block (weights/biases/LN params).

    Single-buffered when supported: invariant blocks never re-DMA, so the
    default second buffer is pure VMEM waste.
    """
    zeros = (0,) * len(shape)
    if _BUFFERED_ONE_OK:
        return pl.BlockSpec(shape, lambda *_: zeros, pipeline_mode=pl.Buffered(1))
    return pl.BlockSpec(shape, lambda *_: zeros)


# ---------------- kernels ----------------

def _embed_ln_kernel(we_ref, pe_ref, te_ref, g_ref, b_ref, o_ref):
    # fused word + position + token-type embedding sum (bf16 in), LN in f32
    x = (we_ref[0].astype(jnp.float32)
         + pe_ref[...].astype(jnp.float32)
         + te_ref[...].astype(jnp.float32))                          # (TS, H)
    o_ref[0] = _layernorm(x, g_ref[...], b_ref[...]).astype(o_ref.dtype)


def _attn_kernel(num_heads, x_ref, maskb_ref, wq_ref, bq_ref, wkv_ref, bkv_ref,
                 wo_ref, bo_ref, g_ref, b_ref, o_ref, k_sc, v_sc):
    qi = pl.program_id(1)
    S, H = x_ref.shape[1], x_ref.shape[2]
    TQ = o_ref.shape[1]
    nh = num_heads
    dh = H // nh

    # K/V for the full sequence: computed once per (batch, layer) at the first
    # q-tile and kept resident in VMEM scratch (no Q/K/V HBM round trip).
    @pl.when(qi == 0)
    def _():
        xf = x_ref[0]                                                # (S, H) bf16
        kv = jnp.dot(xf, wkv_ref[...],
                     preferred_element_type=jnp.float32) + bkv_ref[...]
        kv = kv.astype(k_sc.dtype)                                   # (S, 2H) bf16
        k_sc[...] = kv[:, :H]
        v_sc[...] = kv[:, H:]

    # Q tile, with 1/sqrt(dh) folded into q so the (nh,TQ,S) scores are never scaled.
    row0 = pl.multiple_of(qi * TQ, TQ)
    xq = x_ref[0, pl.ds(row0, TQ), :]                                # (TQ, H) bf16
    q = jnp.dot(xq, wq_ref[...], preferred_element_type=jnp.float32) + bq_ref[...]
    q = (q * (1.0 / math.sqrt(dh))).astype(xq.dtype)                 # (TQ, H) bf16

    qh = jnp.swapaxes(q.reshape(TQ, nh, dh), 0, 1)                   # (nh, TQ, dh)
    kh = jnp.swapaxes(k_sc[...].reshape(S, nh, dh), 0, 1)            # (nh, S,  dh)
    vh = jnp.swapaxes(v_sc[...].reshape(S, nh, dh), 0, 1)            # (nh, S,  dh)

    s = jnp.einsum('hqd,hkd->hqk', qh, kh,
                   preferred_element_type=jnp.float32)               # (nh, TQ, S)
    s = s + maskb_ref[0][None, :, :]
    s = s - jnp.max(s, axis=-1, keepdims=True)
    p = jnp.exp(s)
    denom = jnp.sum(p, axis=-1, keepdims=True)                       # (nh, TQ, 1)

    ctx = jnp.einsum('hqk,hkd->hqd', p.astype(vh.dtype), vh,
                     preferred_element_type=jnp.float32)             # (nh, TQ, dh)
    # normalize AFTER the PV matmul: multiply on (nh,TQ,dh) instead of (nh,TQ,S)
    ctx = ctx * pl.reciprocal(denom, approx=True)
    ctx = jnp.swapaxes(ctx, 0, 1).reshape(TQ, H).astype(xq.dtype)    # (TQ, H) bf16

    attn = jnp.dot(ctx, wo_ref[...], preferred_element_type=jnp.float32) + bo_ref[...]
    h1 = _layernorm(xq.astype(jnp.float32) + attn, g_ref[...], b_ref[...])
    o_ref[0] = h1.astype(o_ref.dtype)


def _ffn_kernel(x_ref, w1_ref, b1_ref, w2_ref, b2_ref, g_ref, b_ref, o_ref):
    x = x_ref[0]                                                     # (TM, H) bf16
    h = jnp.dot(x, w1_ref[...], preferred_element_type=jnp.float32) + b1_ref[...]
    h = _gelu(h).astype(x.dtype)                                     # bf16 into MXU
    y = jnp.dot(h, w2_ref[...], preferred_element_type=jnp.float32) + b2_ref[...]
    y = _layernorm(x.astype(jnp.float32) + y, g_ref[...], b_ref[...])
    o_ref[0] = y.astype(o_ref.dtype)


# ---------------- wrappers ----------------

def embed_layernorm(we, pe, te0, gamma, beta):
    B, S, H = we.shape
    TS = _row_tile(S)
    return pl.pallas_call(
        _embed_ln_kernel,
        grid=(B, S // TS),
        in_specs=[pl.BlockSpec((1, TS, H), lambda b, s: (b, s, 0)),
                  pl.BlockSpec((TS, H), lambda b, s: (s, 0)),
                  _const_spec((1, H)),
                  _const_spec((1, H)),
                  _const_spec((1, H))],
        out_specs=pl.BlockSpec((1, TS, H), lambda b, s: (b, s, 0)),
        out_shape=jax.ShapeDtypeStruct((B, S, H), ACT_DTYPE),
        compiler_params=_cparams(("parallel", "parallel")),
    )(we, pe, te0, gamma, beta)


def attention_block(x, mask_bias, layer, num_heads):
    B, S, H = x.shape
    # Cap the q-tile at 256: f32 (nh,TQ,S) intermediates stay inside a safe
    # v7x 48 MiB budget; 128 MiB parts have slack anyway.
    TQ = _row_tile(S, cap=256)
    return pl.pallas_call(
        partial(_attn_kernel, num_heads),
        grid=(B, S // TQ),
        in_specs=[pl.BlockSpec((1, S, H), lambda b, qi: (b, 0, 0)),   # x: residual + Q/K/V source
                  pl.BlockSpec((1, 1, S), lambda b, qi: (b, 0, 0)),   # additive mask bias
                  _const_spec((H, H)),                                # wq
                  _const_spec((1, H)),                                # bq
                  _const_spec((H, 2 * H)),                            # wkv
                  _const_spec((1, 2 * H)),                            # bkv
                  _const_spec((H, H)),                                # wo
                  _const_spec((1, H)),                                # bo
                  _const_spec((1, H)),                                # ln1 gamma
                  _const_spec((1, H))],                               # ln1 beta
        out_specs=pl.BlockSpec((1, TQ, H), lambda b, qi: (b, qi, 0)),
        out_shape=jax.ShapeDtypeStruct((B, S, H), x.dtype),
        scratch_shapes=[pltpu.VMEM((S, H), ACT_DTYPE),   # K (full seq, persists over q-tiles)
                        pltpu.VMEM((S, H), ACT_DTYPE)],  # V
        compiler_params=_cparams(("parallel", "arbitrary")),
    )(x, mask_bias, layer['wq'], layer['bq'], layer['wkv'], layer['bkv'],
      layer['wo'], layer['bo'], layer['ln1_g'], layer['ln1_b'])


def ffn_block(x, w1, b1, w2, b2, ln_g, ln_b):
    B, S, H = x.shape
    I = w1.shape[1]
    TM = _row_tile(S)
    act_spec = pl.BlockSpec((1, TM, H), lambda b, s: (b, s, 0))
    return pl.pallas_call(
        _ffn_kernel,
        grid=(B, S // TM),
        in_specs=[act_spec,
                  _const_spec((H, I)),
                  _const_spec((1, I)),
                  _const_spec((I, H)),
                  _const_spec((1, H)),
                  _const_spec((1, H)),
                  _const_spec((1, H))],
        out_specs=act_spec,
        out_shape=jax.ShapeDtypeStruct((B, S, H), x.dtype),
        compiler_params=_cparams(("parallel", "parallel")),
    )(x, w1, b1, w2, b2, ln_g, ln_b)


# ---------------- parameters (synthetic, deterministic) ----------------

def init_params(key, vocab_size, max_pos, type_vocab, hidden, intermediate, num_layers):
    keys = jax.random.split(key, 5 + num_layers)

    def dense(k, shape, dtype=jnp.float32):
        return (0.02 * jax.random.normal(k, shape)).astype(dtype)

    params = {
        # embedding tables in bf16: the embed kernel is memory-bound
        'word_emb': dense(keys[0], (vocab_size, hidden), ACT_DTYPE),
        'pos_emb': dense(keys[1], (max_pos, hidden), ACT_DTYPE),
        'type_emb': dense(keys[2], (type_vocab, hidden), ACT_DTYPE),
        'emb_ln_g': jnp.ones((1, hidden), jnp.float32),
        'emb_ln_b': jnp.zeros((1, hidden), jnp.float32),
        # QA heads: Linear(hidden, 1) each -> plain jnp (lane-dense issue)
        'w_start': dense(keys[3], (hidden,)),
        'b_start': jnp.zeros((), jnp.float32),
        'w_end': dense(keys[4], (hidden,)),
        'b_end': jnp.zeros((), jnp.float32),
        'layers': [],
    }
    for l in range(num_layers):
        lk = jax.random.split(keys[5 + l], 5)
        params['layers'].append({
            # MXU-facing weights in bf16; biases / LN params stay f32.
            'wq': dense(lk[0], (hidden, hidden), jnp.bfloat16),
            'bq': jnp.zeros((1, hidden), jnp.float32),
            'wkv': dense(lk[1], (hidden, 2 * hidden), jnp.bfloat16),
            'bkv': jnp.zeros((1, 2 * hidden), jnp.float32),
            'wo': dense(lk[2], (hidden, hidden), jnp.bfloat16),
            'bo': jnp.zeros((1, hidden), jnp.float32),
            'ln1_g': jnp.ones((1, hidden), jnp.float32),
            'ln1_b': jnp.zeros((1, hidden), jnp.float32),
            'w1': dense(lk[3], (hidden, intermediate), jnp.bfloat16),
            'b1': jnp.zeros((1, intermediate), jnp.float32),
            'w2': dense(lk[4], (intermediate, hidden), jnp.bfloat16),
            'b2': jnp.zeros((1, hidden), jnp.float32),
            'ln2_g': jnp.ones((1, hidden), jnp.float32),
            'ln2_b': jnp.zeros((1, hidden), jnp.float32),
        })
    return params


# ---------------- BertQA.forward ----------------

def bert_qa_forward(params, input_seq, attention_mask, num_heads):
    B, S = input_seq.shape
    # embeddings: word + position + token_type(=0), then layernorm (dropout = eval no-op)
    we = params['word_emb'][input_seq]          # (B,S,H) bf16 gather stays in JAX glue
    pe = params['pos_emb'][:S]                  # (S,H) bf16
    te0 = params['type_emb'][0:1]               # (1,H) bf16 (token_type_ids all zero)
    x = embed_layernorm(we, pe, te0, params['emb_ln_g'], params['emb_ln_b'])

    # HF-style extended attention mask: additive -1e4 on padded keys
    mask_bias = ((1.0 - attention_mask.astype(jnp.float32)) * -10000.0)[:, None, :]

    for layer in params['layers']:
        h1 = attention_block(x, mask_bias, layer, num_heads)      # QKV fused inside
        x = ffn_block(h1, layer['w1'], layer['b1'], layer['w2'], layer['b2'],
                      layer['ln2_g'], layer['ln2_b'])             # last_hidden_state (bf16)

    # span heads: both H->1 projections fused as one (H,2) einsum in plain jnp
    # (output dim << 128 lanes would force masked stores inside Pallas);
    # bf16 inputs, f32 accumulation, no f32 copy of the hidden state.
    w_span = jnp.stack([params['w_start'], params['w_end']], axis=1).astype(ACT_DTYPE)
    logits = jnp.einsum('bsh,hc->bsc', x, w_span, preferred_element_type=jnp.float32)
    start_logits = logits[..., 0] + params['b_start']
    end_logits = logits[..., 1] + params['b_end']
    return start_logits, end_logits


# ---------------- pure-JAX f32 reference (for correctness check) ----------------

def _ref_forward(params, input_seq, attention_mask, num_heads):
    f32 = jnp.float32
    B, S = input_seq.shape
    H = params['word_emb'].shape[1]
    dh = H // num_heads

    def ln(x, g, b):
        mu = x.mean(-1, keepdims=True)
        var = ((x - mu) ** 2).mean(-1, keepdims=True)
        return (x - mu) / jnp.sqrt(var + LN_EPS) * g + b

    x = (params['word_emb'].astype(f32)[input_seq]
         + params['pos_emb'].astype(f32)[:S][None]
         + params['type_emb'].astype(f32)[0][None, None])
    x = ln(x, params['emb_ln_g'], params['emb_ln_b'])
    bias = ((1.0 - attention_mask.astype(f32)) * -10000.0)[:, None, None, :]
    for lp in params['layers']:
        q = x @ lp['wq'].astype(f32) + lp['bq']
        kv = x @ lp['wkv'].astype(f32) + lp['bkv']
        k, v = kv[..., :H], kv[..., H:]
        qh = q.reshape(B, S, num_heads, dh).transpose(0, 2, 1, 3)
        kh = k.reshape(B, S, num_heads, dh).transpose(0, 2, 1, 3)
        vh = v.reshape(B, S, num_heads, dh).transpose(0, 2, 1, 3)
        s = qh @ kh.transpose(0, 1, 3, 2) / math.sqrt(dh) + bias
        p = jax.nn.softmax(s, axis=-1)
        ctx = (p @ vh).transpose(0, 2, 1, 3).reshape(B, S, H)
        attn = ctx @ lp['wo'].astype(f32) + lp['bo']
        h1 = ln(x + attn, lp['ln1_g'], lp['ln1_b'])
        h = _gelu(h1 @ lp['w1'].astype(f32) + lp['b1'])
        y = h @ lp['w2'].astype(f32) + lp['b2']
        x = ln(h1 + y, lp['ln2_g'], lp['ln2_b'])
    start = jnp.einsum('bsh,h->bs', x, params['w_start'].astype(f32)) + params['b_start']
    end = jnp.einsum('bsh,h->bs', x, params['w_end'].astype(f32)) + params['b_end']
    return start, end


if __name__ == "__main__":
    B, S, H, I = 2, 8, 32, 64
    NUM_HEADS, NUM_LAYERS = 4, 2
    VOCAB, MAX_POS, TYPE_VOCAB = 100, 16, 2

    key = jax.random.PRNGKey(0)
    pkey, ikey = jax.random.split(key)
    params = init_params(pkey, VOCAB, MAX_POS, TYPE_VOCAB, H, I, NUM_LAYERS)

    input_seq = jax.random.randint(ikey, (B, S), 0, VOCAB, dtype=jnp.int32)
    attention_mask = jnp.array([[1, 1, 1, 1, 1, 1, 1, 1],
                                [1, 1, 1, 1, 1, 0, 0, 0]], dtype=jnp.int32)

    start_logits, end_logits = bert_qa_forward(params, input_seq, attention_mask, NUM_HEADS)
    jax.block_until_ready((start_logits, end_logits))
    assert start_logits.shape == (B, S), start_logits.shape
    assert end_logits.shape == (B, S), end_logits.shape
    assert bool(jnp.all(jnp.isfinite(start_logits)))
    assert bool(jnp.all(jnp.isfinite(end_logits)))

    # loose check vs f32 reference (Pallas path uses bf16 activations/weights)
    ref_start, ref_end = _ref_forward(params, input_seq, attention_mask, NUM_HEADS)
    assert bool(jnp.allclose(start_logits, ref_start, atol=5e-2, rtol=5e-2)), \
        float(jnp.max(jnp.abs(start_logits - ref_start)))
    assert bool(jnp.allclose(end_logits, ref_end, atol=5e-2, rtol=5e-2)), \
        float(jnp.max(jnp.abs(end_logits - ref_end)))
    print("KERNEL_OK")
</pallas_src>

<mosaic_0001>
module attributes {stable_mosaic.version = 11 : i64} {
  func.func @_embed_ln_kernel(%arg0: i32, %arg1: i32, %arg2: memref<1x8x32xbf16, #tpu.memory_space<vmem>>, %arg3: memref<8x32xbf16, #tpu.memory_space<vmem>>, %arg4: memref<1x32xbf16, #tpu.memory_space<vmem>>, %arg5: memref<1x32xf32, #tpu.memory_space<vmem>>, %arg6: memref<1x32xf32, #tpu.memory_space<vmem>>, %arg7: memref<1x8x32xbf16, #tpu.memory_space<vmem>>) attributes {dimension_semantics = [#tpu.dimension_semantics<parallel>, #tpu.dimension_semantics<parallel>], iteration_bounds = array<i64: 2, 1>, scalar_prefetch = 0 : i64, scratch_operands = 0 : i64, tpu.core_type = #tpu.core_type<tc>, window_params = [{transform_indices = @transform_0, window_bounds = array<i64: 1, 8, 32>}, {transform_indices = @transform_1, window_bounds = array<i64: 8, 32>}, {pipeline_mode = #tpu.pipeline_mode<synchronous>, transform_indices = @transform_2, window_bounds = array<i64: 1, 32>}, {pipeline_mode = #tpu.pipeline_mode<synchronous>, transform_indices = @transform_3, window_bounds = array<i64: 1, 32>}, {pipeline_mode = #tpu.pipeline_mode<synchronous>, transform_indices = @transform_4, window_bounds = array<i64: 1, 32>}, {transform_indices = @transform_5, window_bounds = array<i64: 1, 8, 32>}]} {
    %c0 = arith.constant 0 : index
    %c0_0 = arith.constant 0 : index
    %c0_1 = arith.constant 0 : index
    %0 = vector.load %arg2[%c0, %c0_0, %c0_1] : memref<1x8x32xbf16, #tpu.memory_space<vmem>>, vector<1x8x32xbf16>
    %1 = vector.shape_cast %0 : vector<1x8x32xbf16> to vector<8x32xbf16>
    %2 = arith.extf %1 : vector<8x32xbf16> to vector<8x32xf32>
    %c0_2 = arith.constant 0 : index
    %c0_3 = arith.constant 0 : index
    %3 = vector.load %arg3[%c0_2, %c0_3] : memref<8x32xbf16, #tpu.memory_space<vmem>>, vector<8x32xbf16>
    %4 = arith.extf %3 : vector<8x32xbf16> to vector<8x32xf32>
    %5 = arith.addf %2, %4 : vector<8x32xf32>
    %c0_4 = arith.constant 0 : index
    %c0_5 = arith.constant 0 : index
    %6 = vector.load %arg4[%c0_4, %c0_5] : memref<1x32xbf16, #tpu.memory_space<vmem>>, vector<1x32xbf16>
    %7 = arith.extf %6 : vector<1x32xbf16> to vector<1x32xf32>
    %8 = vector.broadcast %7 : vector<1x32xf32> to vector<8x32xf32>
    %9 = arith.addf %5, %8 : vector<8x32xf32>
    %c0_6 = arith.constant 0 : index
    %c0_7 = arith.constant 0 : index
    %10 = vector.load %arg5[%c0_6, %c0_7] : memref<1x32xf32, #tpu.memory_space<vmem>>, vector<1x32xf32>
    %c0_8 = arith.constant 0 : index
    %c0_9 = arith.constant 0 : index
    %11 = vector.load %arg6[%c0_8, %c0_9] : memref<1x32xf32, #tpu.memory_space<vmem>>, vector<1x32xf32>
    %cst = arith.constant dense<0.000000e+00> : vector<8xf32>
    %12 = vector.multi_reduction <add>, %9, %cst [1] : vector<8x32xf32> to vector<8xf32>
    %13 = vector.shape_cast %12 : vector<8xf32> to vector<8x1xf32>
    %cst_10 = arith.constant 3.200000e+01 : f32
    %14 = vector.broadcast %cst_10 : f32 to vector<8x1xf32>
    %15 = arith.divf %13, %14 : vector<8x1xf32>
    %16 = vector.broadcast %15 : vector<8x1xf32> to vector<8x32xf32>
    %17 = arith.subf %9, %16 : vector<8x32xf32>
    %18 = arith.mulf %17, %17 : vector<8x32xf32>
    %cst_11 = arith.constant dense<0.000000e+00> : vector<8xf32>
    %19 = vector.multi_reduction <add>, %18, %cst_11 [1] : vector<8x32xf32> to vector<8xf32>
    %20 = vector.shape_cast %19 : vector<8xf32> to vector<8x1xf32>
    %cst_12 = arith.constant 3.200000e+01 : f32
    %21 = vector.broadcast %cst_12 : f32 to vector<8x1xf32>
    %22 = arith.divf %20, %21 : vector<8x1xf32>
    %23 = vector.broadcast %15 : vector<8x1xf32> to vector<8x32xf32>
    %24 = arith.subf %9, %23 : vector<8x32xf32>
    %cst_13 = arith.constant 9.99999996E-13 : f32
    %25 = vector.broadcast %cst_13 : f32 to vector<8x1xf32>
    %26 = arith.addf %22, %25 : vector<8x1xf32>
    %27 = math.rsqrt %26 : vector<8x1xf32>
    %28 = vector.broadcast %27 : vector<8x1xf32> to vector<8x32xf32>
    %29 = arith.mulf %24, %28 : vector<8x32xf32>
    %30 = vector.broadcast %10 : vector<1x32xf32> to vector<8x32xf32>
    %31 = arith.mulf %29, %30 : vector<8x32xf32>
    %32 = vector.broadcast %11 : vector<1x32xf32> to vector<8x32xf32>
    %33 = arith.addf %31, %32 : vector<8x32xf32>
    %34 = arith.truncf %33 : vector<8x32xf32> to vector<8x32xbf16>
    %c0_14 = arith.constant 0 : index
    %c0_15 = arith.constant 0 : index
    %c0_16 = arith.constant 0 : index
    %35 = vector.load %arg7[%c0_14, %c0_15, %c0_16] : memref<1x8x32xbf16, #tpu.memory_space<vmem>>, vector<1x8x32xbf16>
    %36 = vector.shape_cast %35 : vector<1x8x32xbf16> to vector<8x32xbf16>
    %37 = vector.shape_cast %34 : vector<8x32xbf16> to vector<1x8x32xbf16>
    tpu.vector_store %arg7[%c0_14, %c0_15, %c0_16], %37 {strides = array<i32>} : memref<1x8x32xbf16, #tpu.memory_space<vmem>>, vector<1x8x32xbf16>,
    return
  }
  func.func @transform_0(%arg0: i32, %arg1: i32) -> (i32, i32, i32) {
    %c0_i32 = arith.constant 0 : i32
    %c0_i32_0 = arith.constant 0 : i32
    return %arg0, %arg1, %c0_i32 : i32, i32, i32
  }
  func.func @transform_1(%arg0: i32, %arg1: i32) -> (i32, i32) {
    %c0_i32 = arith.constant 0 : i32
    %c0_i32_0 = arith.constant 0 : i32
    return %arg1, %c0_i32 : i32, i32
  }
  func.func @transform_2(%arg0: i32, %arg1: i32) -> (i32, i32) {
    %c0_i32 = arith.constant 0 : i32
    %c0_i32_0 = arith.constant 0 : i32
    %c0_i32_1 = arith.constant 0 : i32
    return %c0_i32, %c0_i32_0 : i32, i32
  }
  func.func @transform_3(%arg0: i32, %arg1: i32) -> (i32, i32) {
    %c0_i32 = arith.constant 0 : i32
    %c0_i32_0 = arith.constant 0 : i32
    %c0_i32_1 = arith.constant 0 : i32
    return %c0_i32, %c0_i32_0 : i32, i32
  }
  func.func @transform_4(%arg0: i32, %arg1: i32) -> (i32, i32) {
    %c0_i32 = arith.constant 0 : i32
    %c0_i32_0 = arith.constant 0 : i32
    %c0_i32_1 = arith.constant 0 : i32
    return %c0_i32, %c0_i32_0 : i32, i32
  }
  func.func @transform_5(%arg0: i32, %arg1: i32) -> (i32, i32, i32) {
    %c0_i32 = arith.constant 0 : i32
    %c0_i32_0 = arith.constant 0 : i32
    return %arg0, %arg1, %c0_i32 : i32, i32, i32
  }
}

</mosaic_0001>

<bundles_post_ra>
// kernel: tpu_custom_call.1
= control target key start
LH: loop header
LB: loop body
LE: loop exit
PB: predicated region body
PF: predicated region fallthrough
CT: control target
= control target key end

     0   :  { %10 = vsyncpa [#allocation3], 0  ;;  %s930_s0 = inlined_call_operand.hbm [shape: bf16[2,8,32], index: 0, kind: input, shape index: {}]   ;;  %s931_s1 = inlined_call_operand.hbm [shape: bf16[8,32], index: 1, kind: input, shape index: {}]   ;;  %s932_s2 = inlined_call_operand.vmem [shape: bf16[1,32], index: 2, kind: input, shape index: {}]   ;;  %s933_s3 = inlined_call_operand.vmem [shape: f32[1,32], index: 3, kind: input, shape index: {}]   ;;  %s934_s4 = inlined_call_operand.vmem [shape: f32[1,32], index: 4, kind: input, shape index: {}]   ;;  %s935_s5 = inlined_call_operand.hbm [shape: bf16[2,8,32], index: 5, kind: output, shape index: {}]  }
   0x1   :  { %12 = vsyncpa [#allocation3 + $0x1], 0 }
   0x2   :  { %13 = vsyncpa [#allocation6], 0 }
   0x3   :  { %14 = vsyncpa [#allocation4], 0 }
   0x4   :  { %16 = vsyncpa [#allocation4 + $0x1], 0  ;;  %s701_s18 = smov 0   ;;  %s703_s19 = smov 0  }
   0x5   :  { %s705_s20 = smov 0   ;;  %s707_s21 = smov 0  }
   0x6   :  { %s709_s22 = smov 0   ;;  %s711_s23 = smov 0  }
   0x7 LB: > { %s430_s24 = sadd.s32 4294967295, %s666_s23   ;;  %s431_s25 = sadd.s32 4294967294, %s666_s23   ;;  %s666_s23 = sphi %s711_s23, %s22_s23   ;;  %s662_s22 = sphi %s709_s22, %s960_s22   ;;  %s658_s21 = sphi %s707_s21, %s959_s21   ;;  %s654_s20 = sphi %s705_s20, %s958_s20   ;;  %s650_s19 = sphi %s703_s19, %s957_s19   ;;  %s646_s18 = sphi %s701_s18, %s956_s18  }
   0x8   : > { %p56_p0 = scmp.ne.s32.totalorder %s650_s19, %s646_s18  ;;  %p735_p1 = scmp.eq.s32.totalorder %s430_s24, 0 }
   0x9   : > { %p739_p2 = scmp.eq.s32.totalorder %s430_s24, 1  ;;  %p177_p3 = scmp.eq.s32.totalorder %s431_s25, 1 }
   0xa   : > { %s940_s26 = scalar_select %p735_p1, 1, 0 }
   0xb   : > { %s941_s27 = scalar_select %p739_p2, 1, 0 }
   0xc   : > { %p745_p4 = por %p735_p1, %p56_p0  ;;  %p432_p5 = scmp.ge.s32.totalorder %s666_s23, 1 }
   0xd   : > { %p750_p6 = por %p177_p3, %p56_p0  ;;  %p184_p7 = scmp.lt.s32.totalorder %s666_s23, 3 }
   0xe   : > { %s942_s28 = scalar_select %p745_p4, 1, 0 }
   0xf   : > { %s943_s29 = scalar_select %p750_p6, 1, 0 }
  0x10   : > { %p755_p8 = pnand %p432_p5, %p184_p7  ;;  %s668_s6 = smov [#allocation5]  }
  0x11   : > { %s199_s7 = sshll.u32 %s668_s6, 4  ;;  %s34_s9 = sadd.s32 1, %s662_s22  ;;  %s200_s7 = int_to_ptr.vmem [resolvable:$true] %s199_s7 }
  0x12   : > { %s944_s30 = scalar_select %p755_p8, 1, 0 }
  0x13   : > { %p455_p10 = pneg %p755_p8  ;;  %s43_s10 = sadd.s32 1, %s654_s20 }
  0x14   : > { %p770_p12 = scmp.ge.s32.totalorder %s34_s9, 2  ;;  %s522_s14 = scalar_lea.hbm %s931_s1, 64 }
  0x15   : > { %p764_p11 = pnand %p455_p10, %p735_p1  ;;  %p523_p13 = scmp.ne.s32.totalorder %s931_s1, %s522_s14 }
  0x16   : > { %s946_s11 = scalar_select %p770_p12, 1, 0 }
  0x17   : > { %p524_p0 = pneg %p764_p11  ;;  %p529_p7 = scmp.lt.u32.totalorder %s522_s14, %s931_s1 }
  0x19   : > { %p525_p3 = pnand %p524_p0, %p523_p13 }
  0x1b   : > { %p526_p5 = pneg %p525_p3 }
  0x1d   : > { %p531_p10 = pnand %p529_p7, %p526_p5 }
  0x1f   : > { %534 = shalt.err (!%p531_p10)
}
  0x20   : > { %s535_s25 = scalar_lea.vmem %s200_s7, 64  ;;  %p543_p4 = scmp.lt.s32.totalorder %s200_s7, %s200_s7 }
  0x21   : > { %p536_p9 = scmp.ne.s32.totalorder %s200_s7, %s535_s25  ;;  %p544_p8 = scmp.lt.s32.totalorder %s535_s25, %s535_s25 }
  0x23   : > { %p538_p6 = pnand %p536_p9, %p524_p0  ;;  %p545_p2 = por %p544_p8, %p543_p4 }
  0x25   : > { %p539_p1 = pneg %p538_p6 }
  0x27   : > { %p546_p12 = pnand %p545_p2, %p539_p1 }
  0x29   : > { %549 = shalt.err (!%p546_p12)
}
  0x2a   : > { %458 = dma.hbm_to_vmem [thread:$0]  (!%p764_p11), %s931_s1, 64, %s200_s7, [#allocation6]  }
  0x2b   : > { %p947_p4 = scmp.ne.s32.totalorder %s946_s11, 0  ;;  %p50_p1 = scmp.ne.s32.totalorder %s654_s20, %s650_s19 }
  0x2c   : > { %p51_p2 = scmp.eq.s32.totalorder %s666_s23, 0  ;;  %p468_p6 = scmp.lt.s32.totalorder %s666_s23, 2 }
  0x2d   : > { %s962_s9 = smov (%p947_p4, %s34_s9), 0  ;;  %p948_p12 = scmp.ne.s32.totalorder %s941_s27, 0 }
  0x2e   : > { %s38_s8 = ssub.s32 %s662_s22, %s962_s9  ;;  %p52_p9 = por %p51_p2, %p50_p1 }
  0x2f   : > { %p41_p8 = scmp.eq.s32.totalorder %s38_s8, 0  ;;  %p802_p13 = por %p948_p12, %p50_p1 }
  0x30   : > { %s219_s14 = sand.u32 1, %s654_s20   ;;  %s436_s11 = sshll.u32 %s662_s22, 6 }
  0x31   : > { %s810_s15 = scalar_select %p41_p8, %s654_s20, %s43_s10  }
  0x32   : > { %s435_s7 = sshll.u32 %s219_s14, 2  ;;  %s816_s24 = scalar_lea.hbm %s930_s0, %s436_s11 }
  0x33   : > { %s223_s27 = scalar_lea.vmem [#allocation2], %s435_s7  ;;  %p820_p11 = pnand %p468_p6, %p52_p9 }
  0x34   : > { %s231_s25 = sshll.u32 %s223_s27, 4  ;;  %s220_s10 = scalar_lea.sflag [#allocation3], %s219_s14  ;;  %s818_s25 = int_to_ptr.vmem [resolvable:$true] %s231_s25 }
  0x35   : > { %s550_s12 = scalar_lea.hbm %s816_s24, 64  ;;  %p552_p3 = pneg %p820_p11 }
  0x36   : > { %p551_p0 = scmp.ne.s32.totalorder %s816_s24, %s550_s12  ;;  %s555_s11 = scalar_lea.hbm %s930_s0, 128 }
  0x37   : > { %p556_p10 = scmp.lt.u32.totalorder %s816_s24, %s930_s0  ;;  %p557_p4 = scmp.lt.u32.totalorder %s555_s11, %s550_s12 }
  0x38   : > { %p553_p5 = pnand %p552_p3, %p551_p0  ;;  %p559_p2 = scmp.lt.u32.totalorder %s550_s12, %s816_s24 }
  0x39   : > { %p558_p1 = por %p557_p4, %p556_p10 }
  0x3a   : > { %p554_p7 = pneg %p553_p5 }
  0x3b   : > { %p560_p6 = por %p559_p2, %p558_p1 }
  0x3d   : > { %p561_p8 = pnand %p560_p6, %p554_p7 }
  0x3f   : > { %564 = shalt.err (!%p561_p8)
}
  0x40   : > { %s565_s14 = scalar_lea.vmem %s818_s25, 64  ;;  %s669_s27 = smov [#allocation2]  }
  0x41   : > { %p566_p9 = scmp.ne.s32.totalorder %s818_s25, %s565_s14  ;;  %s570_s8 = sshll.u32 %s669_s27, 4  ;;  %s571_s8 = int_to_ptr.vmem [resolvable:$false] %s570_s8 }
  0x42   : > { %s572_s7 = scalar_lea.vmem %s571_s8, 128  ;;  %p573_p5 = scmp.lt.s32.totalorder %s818_s25, %s571_s8 }
  0x43   : > { %p568_p12 = pnand %p566_p9, %p552_p3  ;;  %p574_p10 = scmp.lt.s32.totalorder %s572_s7, %s565_s14 }
  0x45   : > { %p569_p0 = pneg %p568_p12  ;;  %p575_p4 = por %p574_p10, %p573_p5 }
  0x47   : > { %p576_p1 = pnand %p575_p4, %p569_p0 }
  0x49   : > { %579 = shalt.err (!%p576_p1)
}
  0x4a   : > { %462 = dma.hbm_to_vmem [thread:$0]  (!%p820_p11), %s816_s24, 64, %s818_s25, %s220_s10  }
  0x4b   : > { %p951_p7 = scmp.ne.s32.totalorder %s944_s30, 0 }
  0x4c   : > { %s852_s12 = sand.u32 (!%p951_p7), 1, %s650_s19   ;;  %p952_p3 = scmp.ne.s32.totalorder (!%p951_p7), %s942_s28, 0 }
  0x4d   : > { %240 = sbr.rel (%p951_p7) target bundleno = 427 (0x1ab), region = 40  ;;  %s438_s11 = sshll.u32 (!%p951_p7), %s852_s12, 2 }
  0x4e   : > { %s243_s16 = scalar_lea.sflag (!%p951_p7), [#allocation3], %s852_s12  ;;  %s246_s17 = scalar_lea.vmem (!%p951_p7), [#allocation2], %s438_s11 }
  0x54   : > { %633 = dma.done.wait (%p952_p3), %s243_s16, 64  }
  0x55   : > { %635 = vsyncadd (%p952_p3), %s243_s16, 4294967232  ;;  %p953_p11 = scmp.ne.s32.totalorder %s940_s26, 0 }
  0x57   : > { %637 = dma.done.wait (%p953_p11), [#allocation6], 64  }
  0x58   : > { %639 = vsyncadd (%p953_p11), [#allocation6], 4294967232  ;;  %v284_v0 = vlaneseq  ;;  %v277_v3 = vld [vmem:[%s246_s17] sm:$0xf]  ;;  %v279_v4 = vld [vmem:[#allocation5] sm:$0xf] }
  0x59   : > { %v282_v5 = vld [vmem:[%s932_s2] sm:$0x1]  ;;  %v278_v6 = vunpack.c.l.bf16 %v277_v3  ;;  %v280_v7 = vunpack.c.l.bf16 %v279_v4  ;;  %vm291_vm0 = vcmask 261120   ;;  %s444_s10 = sshll.u32 %s658_s21, 6  ;;  %s276_s14 = scalar_lea.vmem [#allocation7], %s438_s11  ;;  %vm321_vm1 = vcmask 257024  }
  0x5a   : > { %v285_v1 = vshrl.u32 %v284_v0, 7  ;;  %v283_v8 = vunpack.c.l.bf16 %v282_v5  ;;  %v441_v22 = vld [vmem:[%s933_s3] ss:$0 sm:$0xff]  ;;  %s338_s27 = sshll.u32 %s276_s14, 4  ;;  %s881_s16 = scalar_lea.hbm %s935_s5, %s444_s10  ;;  %s883_s27 = int_to_ptr.vmem [resolvable:$true] %s338_s27 }
  0x5b   : > { %v281_v9 = vadd.f32 %v280_v7, %v278_v6  ;;  %v442_v24 = vld [vmem:[%s934_s4] ss:$0 sm:$0xff]  ;;  %s324_s17 = scalar_lea.sflag [#allocation4], %s852_s12  ;;  %s580_s30 = scalar_lea.vmem %s883_s27, 64 }
  0x5c   : > { %v286_v2 = vsub.s32 0, %v285_v1  ;;  %p581_p2 = scmp.ne.s32.totalorder %s883_s27, %s580_s30  ;;  %s670_s21 = smov [#allocation7]  }
  0x5d   : > { %s584_s11 = sshll.u32 %s670_s21, 4  ;;  %s585_s11 = int_to_ptr.vmem [resolvable:$false] %s584_s11 }
  0x5e   : > { %v287_v10 = vrot.slane %v283_v8, %v286_v2  ;;  %p582_p6 = pnand %p581_p2, %p802_p13  ;;  %s586_s24 = scalar_lea.vmem %s585_s11, 128 }
  0x5f   : > { %p587_p9 = scmp.lt.s32.totalorder %s883_s27, %s585_s11  ;;  %p588_p12 = scmp.lt.s32.totalorder %s586_s24, %s580_s30 }
  0x60   : > { %v288_v11 = vadd.f32 %v287_v10, %v281_v9  ;;  %p583_p8 = pneg %p582_p6 }
  0x61   : > { %p589_p0 = por %p588_p12, %p587_p9 }
  0x62   : > { %v292_v12 = vsel %vm291_vm0, %v288_v11, 0.0 }
  0x63   : > { %293 = vadd.xlane.f32.xlu0 %v292_v12  ;;  %p590_p5 = pnand %p589_p0, %p583_p8 }
  0xf0   : > { %v294_v13 = vpop.xlane.xlu0 %293 }
  0xf1   : > { %v296_v14 = vmul.f32 0.03125, %v294_v13 }
  0xf3   : > { %v297_v15 = vsub.f32 %v288_v11, %v296_v14 }
  0xf5   : > { %v298_v16 = vmul.f32 %v297_v15, %v297_v15 }
  0xf7   : > { %v299_v17 = vsel %vm291_vm0, %v298_v16, 0.0 }
  0xf8   : > { %300 = vadd.xlane.f32.xlu0 %v299_v17 }
 0x185   : > { %v301_v18 = vpop.xlane.xlu0 %300 }
 0x186   : > { %v302_v19 = vmul.f32 0.03125, %v301_v18 }
 0x188   : > { %v303_v20 = vadd.f32 1e-12, %v302_v19 }
 0x18a   : > { %520 = vrsqrt.f32 %v303_v20 }
 0x194   : > { %v521_v21 = vpop.eup %520 }
 0x195   : > { %v305_v23 = vmul.f32 %v521_v21, %v297_v15 }
 0x197   : > { %v312_v25 = vmul.f32 %v441_v22, %v305_v23 }
 0x199   : > { %v319_v26 = vadd.f32 %v442_v24, %v312_v25 }
 0x19b   : > { %v320_v27 = vpack.c.bf16 %v319_v26, %v319_v26 }
 0x19d   : > { %322 = vst.msk [vmem:[%s276_s14] sm:$0xf] %vm321_vm1, %v320_v27 }
 0x19e   : > { %593 = shalt.err (!%p590_p5)
}
 0x19f   : > { %s594_s12 = scalar_lea.hbm %s881_s16, 64  ;;  %s598_s25 = scalar_lea.hbm %s935_s5, 128 }
 0x1a0   : > { %p595_p10 = scmp.ne.s32.totalorder %s881_s16, %s594_s12  ;;  %p599_p7 = scmp.lt.u32.totalorder %s881_s16, %s935_s5 }
 0x1a1   : > { %p600_p3 = scmp.lt.u32.totalorder %s598_s25, %s594_s12  ;;  %p602_p2 = scmp.lt.u32.totalorder %s594_s12, %s881_s16 }
 0x1a2   : > { %p596_p4 = pnand %p595_p10, %p802_p13 }
 0x1a3   : > { %p601_p11 = por %p600_p3, %p599_p7 }
 0x1a4   : > { %p597_p1 = pneg %p596_p4 }
 0x1a5   : > { %p603_p6 = por %p602_p2, %p601_p11 }
 0x1a7   : > { %p604_p8 = pnand %p603_p6, %p597_p1 }
 0x1a9   : > { %607 = shalt.err (!%p604_p8)
}
 0x1aa   : > { %453 = dma.vmem_to_hbm [thread:$0]  (%p802_p13), %s883_s27, 64, %s881_s16, %s324_s17  }
 0x1ab PF: > { %s350_s14 = sand.u32 1, %s646_s18   ;;  %p954_p9 = scmp.ne.s32.totalorder %s943_s29, 0 }
 0x1ac   : > { %p955_p12 = scmp.ge.s32.totalorder %s666_s23, 2  ;;  %s351_s8 = scalar_lea.sflag [#allocation4], %s350_s14 }
 0x1ae   : > { %p464_p0 = pnand %p955_p12, %p954_p9 }
 0x1b0   : > { %641 = dma.done.wait (!%p464_p0), %s351_s8, 64  }
 0x1b1   : > { %643 = vsyncadd (!%p464_p0), %s351_s8, 4294967232  ;;  %s22_s23 = sadd.s32 1, %s666_s23   ;;  %s956_s18 = smov %s650_s19 }
 0x1b2   : > { %p19_p5 = scmp.ge.s32.totalorder %s22_s23, 4   ;;  %s957_s19 = smov %s654_s20 }
 0x1b3   : > { %s958_s20 = smov %s810_s15  ;;  %s959_s21 = smov %s662_s22 }
 0x1b4   : > { %s960_s22 = smov %s962_s9  ;;  %21 = sbr.rel (!%p19_p5) target bundleno = 7 (0x7), region = 90 }
 0x1bb   :  { %356 = vsyncpa [#allocation3], 1 }
 0x1bc   :  { %358 = vsyncpa [#allocation3 + $0x1], 1 }
 0x1bd   :  { %359 = vsyncpa [#allocation6], 1 }
 0x1be   :  { %360 = vsyncpa [#allocation4], 1 }
 0x1bf   :  { %362 = vsyncpa [#allocation4 + $0x1], 1 }

</bundles_post_ra>
